<compile_context>
chip_gen: v6e
topology: v6e:2x2x1
jax: 0.10.0
libtpu: 0.0.40
codegen_flags: <defaults>
</compile_context>

<pallas_src>
import functools

import jax
import jax.numpy as jnp
from jax.experimental import pallas as pl
from jax.experimental.pallas import tpu as pltpu


def _round_up(x, m):
    return ((x + m - 1) // m) * m


def _cdiv(a, b):
    return -(-a // b)


def _fused_mlp_kernel(x_ref, *refs, n_layers):
    """refs layout: (w0, b0, w1, b1, ..., w_{L-1}, b_{L-1}, o_ref).

    x_ref : (tile_b, D0_pad)        bf16
    w_i   : (Din_pad, Dout_pad)     bf16  (pre-transposed vs PyTorch (out, in))
    b_i   : (1, Dout_pad)           f32
    o_ref : (tile_b, Dlast_pad)     f32
    """
    o_ref = refs[-1]
    h = x_ref[...]  # bf16
    for i in range(n_layers):
        w = refs[2 * i][...]
        b = refs[2 * i + 1][...]
        # bf16 x bf16 MXU matmul with f32 accumulation; bias add in f32.
        h = jnp.dot(h, w, preferred_element_type=jnp.float32) + b
        if i != n_layers - 1:
            # ReLU in f32, then feed the next MXU pass bf16 operands.
            h = jnp.maximum(h, 0.0).astype(jnp.bfloat16)
    o_ref[...] = h.astype(o_ref.dtype)


def init_mlp_params(key, n_inputs, n_hidden, n_classes):
    """Kaiming-normal weights (std = sqrt(2/fan_in)), PyTorch-style biases.

    Weights are stored pre-transposed: shape (in_dim, out_dim).
    """
    dims = [n_inputs] + list(n_hidden) + [n_classes]
    params = []
    for in_dim, out_dim in zip(dims[:-1], dims[1:]):
        key, kw, kb = jax.random.split(key, 3)
        std = jnp.sqrt(2.0 / in_dim)
        w = std * jax.random.normal(kw, (in_dim, out_dim), dtype=jnp.float32)
        bound = 1.0 / jnp.sqrt(in_dim)
        b = jax.random.uniform(kb, (out_dim,), dtype=jnp.float32,
                               minval=-bound, maxval=bound)
        params.append((w, b))
    return params


def prepare_mlp_params(params, n_inputs):
    """One-time padding / dtype conversion of the weights (not per forward call).

    params: list of (w, b) with w of shape (in_dim, out_dim), b of shape (out_dim,).
    Returns a dict holding padded bf16 weights, padded f32 biases, and dims.
    """
    dims = [int(n_inputs)] + [int(w.shape[1]) for (w, _) in params]
    dims_pad = [_round_up(d, 128) for d in dims]
    padded = []
    for li, (w, b) in enumerate(params):
        din, dout = dims[li], dims[li + 1]
        din_p, dout_p = dims_pad[li], dims_pad[li + 1]
        w_p = jnp.pad(w, ((0, din_p - din), (0, dout_p - dout))).astype(jnp.bfloat16)
        b_p = jnp.pad(b, (0, dout_p - dout)).astype(jnp.float32).reshape(1, dout_p)
        padded.append((w_p, b_p))
    return {"params": padded, "dims": dims, "dims_pad": dims_pad}


def _pick_batch_tiling(batch):
    # >= 2 grid steps so v7x's two TensorCores both get work when the batch
    # axis is marked "parallel"; cap tiles at 256 rows (fits v7x's 64 MiB VMEM
    # alongside resident weights; v5e/v6e have even more headroom).
    n_tiles = max(2, _cdiv(batch, 256))
    tile_b = min(256, max(8, _round_up(_cdiv(batch, n_tiles), 8)))
    b_pad = max(_round_up(batch, tile_b), 2 * tile_b)
    return tile_b, b_pad


def mlp_forward(x, prepared, *, return_padded=False):
    """Fused MLP forward in a single pallas_call.

    x: (batch, n_inputs) array. prepared: output of prepare_mlp_params.
    """
    params = prepared["params"]
    dims = prepared["dims"]
    dims_pad = prepared["dims_pad"]
    n_layers = len(params)
    batch, n_in = x.shape
    assert n_in == dims[0], (n_in, dims[0])

    tile_b, b_pad = _pick_batch_tiling(batch)

    # Only the input needs per-call padding; weights were padded once.
    x_p = x.astype(jnp.bfloat16)
    if (b_pad, dims_pad[0]) != (batch, n_in):
        x_p = jnp.pad(x_p, ((0, b_pad - batch), (0, dims_pad[0] - n_in)))

    grid = (b_pad // tile_b,)
    in_specs = [pl.BlockSpec((tile_b, dims_pad[0]), lambda i: (i, 0))]
    flat_inputs = [x_p]
    for w_p, b_p in params:
        # Constant block index -> resident across all batch tiles; single
        # buffered since the block never changes between grid steps.
        in_specs.append(pl.BlockSpec(w_p.shape, lambda i: (0, 0),
                                     pipeline_mode=pl.Buffered(1)))
        in_specs.append(pl.BlockSpec(b_p.shape, lambda i: (0, 0),
                                     pipeline_mode=pl.Buffered(1)))
        flat_inputs.extend([w_p, b_p])

    out_pad = dims_pad[-1]
    out_specs = pl.BlockSpec((tile_b, out_pad), lambda i: (i, 0))

    # Scoped-VMEM budget from the actual resident footprint (+30% headroom):
    # bf16 weights + f32 biases (single-buffered) + double-buffered x/out tiles
    # + a few live activation tiles.
    weight_bytes = sum(w.size * w.dtype.itemsize + b.size * b.dtype.itemsize
                       for (w, b) in params)
    io_bytes = 2 * tile_b * dims_pad[0] * 2 + 2 * tile_b * out_pad * 4
    act_bytes = 3 * tile_b * max(dims_pad) * 4
    vmem_limit = int(1.3 * (weight_bytes + io_bytes + act_bytes))
    vmem_limit = min(max(vmem_limit, 32 * 1024 * 1024), 128 * 1024 * 1024)

    flops = sum(2 * b_pad * dims_pad[li] * dims_pad[li + 1]
                for li in range(n_layers))
    bytes_accessed = int(x_p.size * 2 + weight_bytes + b_pad * out_pad * 4)
    cost = pl.CostEstimate(flops=flops, transcendentals=0,
                           bytes_accessed=bytes_accessed)

    kernel = functools.partial(_fused_mlp_kernel, n_layers=n_layers)
    out_p = pl.pallas_call(
        kernel,
        out_shape=jax.ShapeDtypeStruct((b_pad, out_pad), jnp.float32),
        grid_spec=pl.GridSpec(grid=grid, in_specs=in_specs, out_specs=out_specs),
        compiler_params=pltpu.CompilerParams(
            dimension_semantics=("parallel",),
            vmem_limit_bytes=vmem_limit,
        ),
        cost_estimate=cost,
    )(*flat_inputs)

    if return_padded:
        # Caller gets the lane-dense padded slab plus the logical shape,
        # avoiding an extra HBM copy for the slice.
        return out_p, (batch, dims[-1])
    return out_p[:batch, :dims[-1]]


if __name__ == "__main__":
    # Small, deterministic example consistent with the module's interface.
    n_inputs = 16
    n_hidden = [32, 32]
    n_classes = 10
    batch = 8

    key = jax.random.PRNGKey(0)
    key, kx = jax.random.split(key)
    x = jax.random.normal(kx, (batch, n_inputs), dtype=jnp.float32)

    params = init_mlp_params(key, n_inputs, n_hidden, n_classes)
    prepared = prepare_mlp_params(params, n_inputs)   # one-time padding / bf16

    out = jax.block_until_ready(mlp_forward(x, prepared))
    assert out.shape == (batch, n_classes)

    # Reference with the same bf16-operand / f32-accumulate math as the kernel.
    ref = x.astype(jnp.bfloat16)
    for idx, (w, b) in enumerate(params):
        ref = jnp.dot(ref, w.astype(jnp.bfloat16),
                      preferred_element_type=jnp.float32) + b
        if idx != len(params) - 1:
            ref = jnp.maximum(ref, 0.0).astype(jnp.bfloat16)
    assert jnp.allclose(out, ref, atol=2e-2, rtol=2e-2), (
        float(jnp.max(jnp.abs(out - ref))))

    # Loose sanity check against full-f32 math (bf16 operands introduce ~0.5%
    # relative error -- expected and acceptable for this inference path).
    ref32 = x
    for idx, (w, b) in enumerate(params):
        ref32 = ref32 @ w + b
        if idx != len(params) - 1:
            ref32 = jnp.maximum(ref32, 0.0)
    assert jnp.allclose(out, ref32, atol=1e-1, rtol=1e-1)

    print("KERNEL_OK")
</pallas_src>

<mosaic_0001>
module attributes {stable_mosaic.version = 11 : i64} {
  func.func @_fused_mlp_kernel(%arg0: i32, %arg1: memref<8x128xbf16, #tpu.memory_space<vmem>>, %arg2: memref<128x128xbf16, #tpu.memory_space<vmem>>, %arg3: memref<1x128xf32, #tpu.memory_space<vmem>>, %arg4: memref<128x128xbf16, #tpu.memory_space<vmem>>, %arg5: memref<1x128xf32, #tpu.memory_space<vmem>>, %arg6: memref<128x128xbf16, #tpu.memory_space<vmem>>, %arg7: memref<1x128xf32, #tpu.memory_space<vmem>>, %arg8: memref<8x128xf32, #tpu.memory_space<vmem>>) attributes {dimension_semantics = [#tpu.dimension_semantics<parallel>], iteration_bounds = array<i64: 2>, scalar_prefetch = 0 : i64, scratch_operands = 0 : i64, tpu.core_type = #tpu.core_type<tc>, window_params = [{transform_indices = @transform_0, window_bounds = array<i64: 8, 128>}, {pipeline_mode = #tpu.pipeline_mode<synchronous>, transform_indices = @transform_1, window_bounds = array<i64: 128, 128>}, {pipeline_mode = #tpu.pipeline_mode<synchronous>, transform_indices = @transform_2, window_bounds = array<i64: 1, 128>}, {pipeline_mode = #tpu.pipeline_mode<synchronous>, transform_indices = @transform_3, window_bounds = array<i64: 128, 128>}, {pipeline_mode = #tpu.pipeline_mode<synchronous>, transform_indices = @transform_4, window_bounds = array<i64: 1, 128>}, {pipeline_mode = #tpu.pipeline_mode<synchronous>, transform_indices = @transform_5, window_bounds = array<i64: 128, 128>}, {pipeline_mode = #tpu.pipeline_mode<synchronous>, transform_indices = @transform_6, window_bounds = array<i64: 1, 128>}, {transform_indices = @transform_7, window_bounds = array<i64: 8, 128>}]} {
    %c0 = arith.constant 0 : index
    %c0_0 = arith.constant 0 : index
    %0 = vector.load %arg1[%c0, %c0_0] : memref<8x128xbf16, #tpu.memory_space<vmem>>, vector<8x128xbf16>
    %c0_1 = arith.constant 0 : index
    %c0_2 = arith.constant 0 : index
    %1 = vector.load %arg2[%c0_1, %c0_2] : memref<128x128xbf16, #tpu.memory_space<vmem>>, vector<128x128xbf16>
    %c0_3 = arith.constant 0 : index
    %c0_4 = arith.constant 0 : index
    %2 = vector.load %arg3[%c0_3, %c0_4] : memref<1x128xf32, #tpu.memory_space<vmem>>, vector<1x128xf32>
    %cst = arith.constant dense<0.000000e+00> : vector<8x128xf32>
    %3 = tpu.matmul %0, %1, %cst {dimension_numbers = #tpu.dot_dimension_numbers<[1], [0], [0], [1], [0, 0, 1, 1], [], []>} : vector<8x128xbf16>, vector<128x128xbf16>, vector<8x128xf32> -> vector<8x128xf32>
    %4 = vector.broadcast %2 : vector<1x128xf32> to vector<8x128xf32>
    %5 = arith.addf %3, %4 : vector<8x128xf32>
    %cst_5 = arith.constant 0.000000e+00 : f32
    %6 = vector.broadcast %cst_5 : f32 to vector<8x128xf32>
    %7 = arith.maximumf %5, %6 : vector<8x128xf32>
    %8 = arith.truncf %7 : vector<8x128xf32> to vector<8x128xbf16>
    %c0_6 = arith.constant 0 : index
    %c0_7 = arith.constant 0 : index
    %9 = vector.load %arg4[%c0_6, %c0_7] : memref<128x128xbf16, #tpu.memory_space<vmem>>, vector<128x128xbf16>
    %c0_8 = arith.constant 0 : index
    %c0_9 = arith.constant 0 : index
    %10 = vector.load %arg5[%c0_8, %c0_9] : memref<1x128xf32, #tpu.memory_space<vmem>>, vector<1x128xf32>
    %cst_10 = arith.constant dense<0.000000e+00> : vector<8x128xf32>
    %11 = tpu.matmul %8, %9, %cst_10 {dimension_numbers = #tpu.dot_dimension_numbers<[1], [0], [0], [1], [0, 0, 1, 1], [], []>} : vector<8x128xbf16>, vector<128x128xbf16>, vector<8x128xf32> -> vector<8x128xf32>
    %12 = vector.broadcast %10 : vector<1x128xf32> to vector<8x128xf32>
    %13 = arith.addf %11, %12 : vector<8x128xf32>
    %cst_11 = arith.constant 0.000000e+00 : f32
    %14 = vector.broadcast %cst_11 : f32 to vector<8x128xf32>
    %15 = arith.maximumf %13, %14 : vector<8x128xf32>
    %16 = arith.truncf %15 : vector<8x128xf32> to vector<8x128xbf16>
    %c0_12 = arith.constant 0 : index
    %c0_13 = arith.constant 0 : index
    %17 = vector.load %arg6[%c0_12, %c0_13] : memref<128x128xbf16, #tpu.memory_space<vmem>>, vector<128x128xbf16>
    %c0_14 = arith.constant 0 : index
    %c0_15 = arith.constant 0 : index
    %18 = vector.load %arg7[%c0_14, %c0_15] : memref<1x128xf32, #tpu.memory_space<vmem>>, vector<1x128xf32>
    %cst_16 = arith.constant dense<0.000000e+00> : vector<8x128xf32>
    %19 = tpu.matmul %16, %17, %cst_16 {dimension_numbers = #tpu.dot_dimension_numbers<[1], [0], [0], [1], [0, 0, 1, 1], [], []>} : vector<8x128xbf16>, vector<128x128xbf16>, vector<8x128xf32> -> vector<8x128xf32>
    %20 = vector.broadcast %18 : vector<1x128xf32> to vector<8x128xf32>
    %21 = arith.addf %19, %20 : vector<8x128xf32>
    %c0_17 = arith.constant 0 : index
    %c0_18 = arith.constant 0 : index
    %22 = vector.load %arg8[%c0_17, %c0_18] : memref<8x128xf32, #tpu.memory_space<vmem>>, vector<8x128xf32>
    tpu.vector_store %arg8[%c0_17, %c0_18], %21 {strides = array<i32>} : memref<8x128xf32, #tpu.memory_space<vmem>>, vector<8x128xf32>,
    return
  }
  func.func @transform_0(%arg0: i32) -> (i32, i32) {
    %c0_i32 = arith.constant 0 : i32
    %c0_i32_0 = arith.constant 0 : i32
    return %arg0, %c0_i32 : i32, i32
  }
  func.func @transform_1(%arg0: i32) -> (i32, i32) {
    %c0_i32 = arith.constant 0 : i32
    %c0_i32_0 = arith.constant 0 : i32
    %c0_i32_1 = arith.constant 0 : i32
    return %c0_i32, %c0_i32_0 : i32, i32
  }
  func.func @transform_2(%arg0: i32) -> (i32, i32) {
    %c0_i32 = arith.constant 0 : i32
    %c0_i32_0 = arith.constant 0 : i32
    %c0_i32_1 = arith.constant 0 : i32
    return %c0_i32, %c0_i32_0 : i32, i32
  }
  func.func @transform_3(%arg0: i32) -> (i32, i32) {
    %c0_i32 = arith.constant 0 : i32
    %c0_i32_0 = arith.constant 0 : i32
    %c0_i32_1 = arith.constant 0 : i32
    return %c0_i32, %c0_i32_0 : i32, i32
  }
  func.func @transform_4(%arg0: i32) -> (i32, i32) {
    %c0_i32 = arith.constant 0 : i32
    %c0_i32_0 = arith.constant 0 : i32
    %c0_i32_1 = arith.constant 0 : i32
    return %c0_i32, %c0_i32_0 : i32, i32
  }
  func.func @transform_5(%arg0: i32) -> (i32, i32) {
    %c0_i32 = arith.constant 0 : i32
    %c0_i32_0 = arith.constant 0 : i32
    %c0_i32_1 = arith.constant 0 : i32
    return %c0_i32, %c0_i32_0 : i32, i32
  }
  func.func @transform_6(%arg0: i32) -> (i32, i32) {
    %c0_i32 = arith.constant 0 : i32
    %c0_i32_0 = arith.constant 0 : i32
    %c0_i32_1 = arith.constant 0 : i32
    return %c0_i32, %c0_i32_0 : i32, i32
  }
  func.func @transform_7(%arg0: i32) -> (i32, i32) {
    %c0_i32 = arith.constant 0 : i32
    %c0_i32_0 = arith.constant 0 : i32
    return %arg0, %c0_i32 : i32, i32
  }
}

</mosaic_0001>

<bundles_post_ra>
// kernel: tpu_custom_call.1
= control target key start
LH: loop header
LB: loop body
LE: loop exit
PB: predicated region body
PF: predicated region fallthrough
CT: control target
= control target key end

     0   :  { %s1489_s0 = inlined_call_operand.hbm [shape: bf16[16,128], index: 0, kind: input, shape index: {}]   ;;  %s1490_s1 = inlined_call_operand.hbm [shape: bf16[128,128], index: 1, kind: input, shape index: {}]   ;;  %s1491_s2 = inlined_call_operand.vmem [shape: f32[1,128], index: 2, kind: input, shape index: {}]   ;;  %s1492_s3 = inlined_call_operand.hbm [shape: bf16[128,128], index: 3, kind: input, shape index: {}]   ;;  %s1493_s4 = inlined_call_operand.vmem [shape: f32[1,128], index: 4, kind: input, shape index: {}]   ;;  %s1494_s5 = inlined_call_operand.hbm [shape: bf16[128,128], index: 5, kind: input, shape index: {}]   ;;  %s1495_s6 = inlined_call_operand.vmem [shape: f32[1,128], index: 6, kind: input, shape index: {}]   ;;  %s1496_s7 = inlined_call_operand.hbm [shape: f32[16,128], index: 7, kind: output, shape index: {}]  }
   0x1   :  { %1501 = sst [smem:[#allocation15_spill]] %s1490_s1 }
   0x2   :  { %1502 = sst [smem:[#allocation16_spill]] %s1492_s3 }
   0x3   :  { %12 = vsyncpa [#allocation3], 0 }
   0x4   :  { %14 = vsyncpa [#allocation3 + $0x1], 0 }
   0x5   :  { %15 = vsyncpa [#allocation6], 0 }
   0x6   :  { %16 = vsyncpa [#allocation9], 0 }
   0x7   :  { %17 = vsyncpa [#allocation4], 0 }
   0x8   :  { %19 = vsyncpa [#allocation4 + $0x1], 0  ;;  %s1257_s24 = smov 0   ;;  %s1259_s25 = smov 0  }
   0x9   :  { %s1261_s26 = smov 0   ;;  %s1263_s27 = smov 0  }
   0xa LB: > { %s1278_s28 = sadd.s32 4294967295, %s1206_s27   ;;  %s791_s29 = sadd.s32 4294967294, %s1206_s27   ;;  %s1206_s27 = sphi %s1263_s27, %s1524_s27   ;;  %s1202_s26 = sphi %s1261_s26, %s1523_s26   ;;  %s1198_s25 = sphi %s1259_s25, %s1522_s25   ;;  %s1194_s24 = sphi %s1257_s24, %s1521_s24  }
   0xb   : > { %p45_p0 = scmp.ne.s32.totalorder %s1198_s25, %s1194_s24  ;;  %p1497_p1 = scmp.eq.s32.totalorder %s1278_s28, 0 }
   0xc   : > { %p201_p3 = scmp.eq.s32.totalorder %s791_s29, 1  ;;  %p792_p5 = scmp.ge.s32.totalorder %s1206_s27, 1 }
   0xd   : > { %p1287_p4 = por %p1497_p1, %p45_p0  ;;  %p208_p7 = scmp.lt.s32.totalorder %s1206_s27, 3 }
   0xe   : > { %p1292_p6 = por %p201_p3, %p45_p0  ;;  %s1208_s10 = smov [#allocation5]  }
   0xf   : > { %s1503_s30 = scalar_select %p1287_p4, 1, 0 }
  0x10   : > { %s1504_s8 = scalar_select %p1292_p6, 1, 0 }
  0x11   : > { %p1297_p8 = pnand %p792_p5, %p208_p7  ;;  %s220_s11 = sshll.u32 %s1208_s10, 4  ;;  %s221_s11 = int_to_ptr.vmem [resolvable:$true] %s220_s11 }
  0x12   : > { %s1209_s13 = smov [#allocation7]   ;;  %s1210_s15 = smov [#allocation8]  }
  0x13   : > { %s1505_s9 = scalar_select %p1297_p8, 1, 0 }
  0x14   : > { %p939_p9 = pneg %p1297_p8  ;;  %s236_s14 = sshll.u32 %s1209_s13, 4  ;;  %s237_s14 = int_to_ptr.vmem [resolvable:$true] %s236_s14 }
  0x15   : > { %s252_s16 = sshll.u32 %s1210_s15, 4  ;;  %s1039_s17 = scalar_lea.vmem %s221_s11, 1024  ;;  %s253_s16 = int_to_ptr.vmem [resolvable:$true] %s252_s16 }
  0x16   : > { %p1306_p11 = pnand %p939_p9, %p1497_p1  ;;  %p1040_p13 = scmp.ne.s32.totalorder %s221_s11, %s1039_s17 }
  0x17   : > { %p1047_p5 = scmp.lt.s32.totalorder %s221_s11, %s221_s11  ;;  %p1048_p7 = scmp.lt.s32.totalorder %s1039_s17, %s1039_s17 }
  0x18   : > { %p1030_p12 = pneg %p1306_p11 }
  0x19   : > { %p1049_p9 = por %p1048_p7, %p1047_p5 }
  0x1a   : > { %p1042_p0 = pnand %p1040_p13, %p1030_p12 }
  0x1c   : > { %p1043_p3 = pneg %p1042_p0 }
  0x1e   : > { %p1050_p10 = pnand %p1049_p9, %p1043_p3 }
  0x20   : > { %1053 = shalt.err (!%p1050_p10)
}
  0x21   : > { %s1211_s18 = smov 64   ;;  %s1212_s19 = smov 4  }
  0x22   : > { %s1507_s1 = sld [smem:[#allocation15_spill]]  ;;  %s1065_s22 = scalar_lea.vmem %s237_s14, 1024 }
  0x23   : > { %p1066_p1 = scmp.ne.s32.totalorder %s237_s14, %s1065_s22  ;;  %p1073_p2 = scmp.lt.s32.totalorder %s237_s14, %s237_s14 }
  0x24   : > { %p1074_p6 = scmp.lt.s32.totalorder %s1065_s22, %s1065_s22 }
  0x25   : > { %p1068_p13 = pnand %p1066_p1, %p1030_p12 }
  0x26   : > { %p1075_p5 = por %p1074_p6, %p1073_p2 }
  0x27   : > { %p1069_p0 = pneg %p1068_p13 }
  0x28   : > { %942 = dma.hbm_to_vmem [thread:$0]  (!%p1306_p11), %s1507_s1, 1024, %s221_s11, [#allocation6], %s1211_s18, %s1211_s18, %s1212_s19  }
  0x29   : > { %p1076_p3 = pnand %p1075_p5, %p1069_p0 }
  0x2b   : > { %1079 = shalt.err (!%p1076_p3)
}
  0x2c   : > { %s1508_s3 = sld [smem:[#allocation16_spill]]  ;;  %s1091_s10 = scalar_lea.vmem %s253_s16, 1024 }
  0x2d   : > { %p1092_p10 = scmp.ne.s32.totalorder %s253_s16, %s1091_s10  ;;  %p1099_p9 = scmp.lt.s32.totalorder %s253_s16, %s253_s16 }
  0x2e   : > { %p1100_p13 = scmp.lt.s32.totalorder %s1091_s10, %s1091_s10 }
  0x2f   : > { %p1094_p7 = pnand %p1092_p10, %p1030_p12 }
  0x30   : > { %p1101_p4 = por %p1100_p13, %p1099_p9 }
  0x31   : > { %p1095_p1 = pneg %p1094_p7 }
  0x32   : > { %945 = dma.hbm_to_vmem [thread:$0]  (!%p1306_p11), %s1508_s3, 1024, %s237_s14, [#allocation6], %s1211_s18, %s1211_s18, %s1212_s19  }
  0x33   : > { %p1102_p2 = pnand %p1101_p4, %p1095_p1 }
  0x35   : > { %1105 = shalt.err (!%p1102_p2)
}
  0x36   : > { %948 = dma.hbm_to_vmem [thread:$0]  (!%p1306_p11), %s1494_s5, 1024, %s253_s16, [#allocation9], %s1211_s18, %s1211_s18, %s1212_s19  }
  0x37   : > { %s1337_s14 = sadd.s32 1, %s1206_s27   ;;  %s32_s12 = sadd.s32 1, %s1202_s26 }
  0x38   : > { %s29_s15 = ssub.s32 %s1206_s27, %s1337_s14  ;;  %p39_p6 = scmp.ne.s32.totalorder %s1202_s26, %s1198_s25 }
  0x39   : > { %p30_p4 = scmp.eq.s32.totalorder %s29_s15, 0  ;;  %p40_p12 = scmp.eq.s32.totalorder %s1206_s27, 0 }
  0x3a   : > { %p960_p0 = scmp.lt.s32.totalorder %s1206_s27, 2  ;;  %p1509_p3 = scmp.eq.s32.totalorder %s1278_s28, 1 }
  0x3b   : > { %s1347_s17 = scalar_select %p30_p4, %s1202_s26, %s32_s12  }
  0x3c   : > { %p41_p5 = por %p40_p12, %p39_p6  ;;  %p1351_p10 = por %p1509_p3, %p39_p6 }
  0x3d   : > { %s269_s21 = sand.u32 1, %s1202_s26   ;;  %s798_s22 = sshll.u32 %s1206_s27, 6 }
  0x3e   : > { %s1510_s20 = scalar_select %p1351_p10, 1, 0 }
  0x3f   : > { %s797_s16 = sshll.u32 %s269_s21, 2  ;;  %s1360_s23 = scalar_lea.hbm %s1489_s0, %s798_s22 }
  0x40   : > { %s273_s29 = scalar_lea.vmem [#allocation2], %s797_s16  ;;  %p1362_p11 = pnand %p960_p0, %p41_p5 }
  0x41   : > { %s280_s10 = sshll.u32 %s273_s29, 4  ;;  %s270_s13 = scalar_lea.sflag [#allocation3], %s269_s21  ;;  %s281_s10 = int_to_ptr.vmem [resolvable:$true] %s280_s10 }
  0x42   : > { %s1106_s15 = scalar_lea.hbm %s1360_s23, 64  ;;  %p1108_p1 = pneg %p1362_p11 }
  0x43   : > { %p1107_p7 = scmp.ne.s32.totalorder %s1360_s23, %s1106_s15  ;;  %s1111_s18 = scalar_lea.hbm %s1489_s0, 128 }
  0x44   : > { %p1112_p2 = scmp.lt.s32.totalorder %s1360_s23, %s1489_s0  ;;  %p1113_p4 = scmp.lt.s32.totalorder %s1111_s18, %s1106_s15 }
  0x45   : > { %p1109_p9 = pnand %p1108_p1, %p1107_p7 }
  0x46   : > { %p1114_p6 = por %p1113_p4, %p1112_p2 }
  0x47   : > { %p1110_p13 = pneg %p1109_p9 }
  0x49   : > { %p1115_p12 = pnand %p1114_p6, %p1110_p13 }
  0x4b   : > { %1118 = shalt.err (!%p1115_p12)
}
  0x4c   : > { %s1119_s29 = scalar_lea.vmem %s281_s10, 64  ;;  %s1213_s21 = smov [#allocation2]  }
  0x4d   : > { %p1120_p0 = scmp.ne.s32.totalorder %s281_s10, %s1119_s29  ;;  %s1124_s1 = sshll.u32 %s1213_s21, 4  ;;  %s1125_s1 = int_to_ptr.vmem [resolvable:$false] %s1124_s1 }
  0x4e   : > { %s1126_s3 = scalar_lea.vmem %s1125_s1, 128  ;;  %p1127_p7 = scmp.lt.s32.totalorder %s281_s10, %s1125_s1 }
  0x4f   : > { %p1122_p5 = pnand %p1120_p0, %p1108_p1  ;;  %p1128_p9 = scmp.lt.s32.totalorder %s1126_s3, %s1119_s29 }
  0x51   : > { %p1123_p3 = pneg %p1122_p5  ;;  %p1129_p10 = por %p1128_p9, %p1127_p7 }
  0x53   : > { %p1130_p8 = pnand %p1129_p10, %p1123_p3 }
  0x55   : > { %1133 = shalt.err (!%p1130_p8)
}
  0x56   : > { %952 = dma.hbm_to_vmem [thread:$0]  (!%p1362_p11), %s1360_s23, 64, %s281_s10, %s270_s13  }
  0x57   : > { %p1512_p13 = scmp.ne.s32.totalorder %s1505_s9, 0 }
  0x58   : > { %s1383_s15 = sand.u32 (!%p1512_p13), 1, %s1198_s25   ;;  %p1513_p1 = scmp.ne.s32.totalorder (!%p1512_p13), %s1503_s30, 0 }
  0x59   : > { %289 = sbr.rel (%p1512_p13) target bundleno = 742 (0x2e6), region = 48  ;;  %s800_s12 = sshll.u32 (!%p1512_p13), %s1383_s15, 2 }
  0x5a   : > { %s292_s22 = scalar_lea.sflag (!%p1512_p13), [#allocation3], %s1383_s15  ;;  %s1387_s1 = scalar_lea.vmem (!%p1512_p13), [#allocation2], %s800_s12 }
  0x5e   : > { %1177 = dma.done.wait (%p1513_p1), %s292_s22, 64  }
  0x5f   : > { %1179 = vsyncadd (%p1513_p1), %s292_s22, 4294967232  ;;  %p1514_p8 = scmp.eq.s32.totalorder %s1278_s28, 0 }
  0x61   : > { %1181 = dma.done.wait (%p1514_p8), [#allocation6], 2048   ;;  %p1515_p10 = pmov %p1514_p8 }
  0x62   : > { %p1516_p11 = pmov %p1514_p8 }
  0x63   : > { %1183 = vsyncadd (%p1515_p10), [#allocation6], 4294965248 }
  0x64   : > { %1185 = dma.done.wait (%p1516_p11), [#allocation9], 1024   ;;  %p1517_p2 = pmov %p1514_p8 }
  0x65   : > { %v1214_v0 = vmov 0.0   ;;  %vm1215_vm0 = vmmov 0   ;;  %v1004_v1 = vld [vmem:[#allocation5 + $0x38] sm:$0xff]   ;;  %v1005_v2 = vld [vmem:[#allocation5 + $0x30] sm:$0xff]   ;;  %v1006_v3 = vld [vmem:[#allocation5 + $0x28] sm:$0xff]   ;;  %s804_s10 = sshll.u32 %s1383_s15, 3 }
  0x66   : > { %1187 = vsyncadd (%p1517_p2), [#allocation9], 4294966272  ;;  %863 = vmatprep.subr.bf16.mxu0 %v1214_v0  ;;  %879 = vmatprep.mubr.msk.bf16.mxu0 %vm1215_vm0, %v1214_v0  ;;  %v1012_v4 = vld [vmem:[#allocation7 + $0x38] sm:$0xff]   ;;  %v1007_v5 = vld [vmem:[#allocation5 + $0x20] sm:$0xff]   ;;  %s833_s18 = sshll.u32 %s1278_s28, 7  ;;  %s337_s19 = scalar_lea.vmem [#allocation10], %s804_s10 }
  0x67   : > { %883 = vmatprep.subr.bf16.mxu1 %v1214_v0  ;;  %899 = vmatprep.mubr.msk.bf16.mxu1 %vm1215_vm0, %v1214_v0  ;;  %v1013_v6 = vld [vmem:[#allocation7 + $0x30] sm:$0xff]   ;;  %v1008_v7 = vld [vmem:[#allocation5 + $0x18] sm:$0xff]   ;;  %v1014_v8 = vld [vmem:[#allocation7 + $0x28] sm:$0xff]   ;;  %s692_s16 = sshll.u32 %s337_s19, 4  ;;  %s1446_s12 = scalar_lea.hbm %s1496_s7, %s833_s18  ;;  %s1448_s16 = int_to_ptr.vmem [resolvable:$true] %s692_s16 }
  0x68   : > { %864 = vmatpush3.bf16.msra.mxu0 %v1004_v1  ;;  %884 = vmatpush3.bf16.msra.mxu1 %v1012_v4  ;;  %v1009_v9 = vld [vmem:[#allocation5 + $0x10] sm:$0xff]   ;;  %v1015_v10 = vld [vmem:[#allocation7 + $0x20] sm:$0xff]   ;;  %v1010_v11 = vld [vmem:[#allocation5 + $0x8] sm:$0xff]   ;;  %s679_s22 = scalar_lea.sflag [#allocation4], %s1383_s15  ;;  %p1518_p6 = scmp.ne.s32.totalorder %s1510_s20, 0 }
  0x69   : > { %865 = vmatprep.subr.bf16.mxu0 %v1214_v0  ;;  %885 = vmatprep.subr.bf16.mxu1 %v1214_v0  ;;  %v1016_v12 = vld [vmem:[#allocation7 + $0x18] sm:$0xff]   ;;  %v1011_v13 = vld [vmem:[#allocation5] sm:$0xff]   ;;  %v1017_v14 = vld [vmem:[#allocation7 + $0x10] sm:$0xff]   ;;  %s1216_s28 = smov [#allocation10]  }
  0x6a   : > { %v339_v15 = vld [vmem:[%s1387_s1] sm:$0xf]  ;;  %v1018_v16 = vld [vmem:[#allocation7 + $0x8] sm:$0xff]   ;;  %v1019_v17 = vld [vmem:[#allocation7] sm:$0xff]   ;;  %s1134_s1 = scalar_lea.vmem %s1448_s16, 128  ;;  %s1138_s3 = sshll.u32 %s1216_s28, 4  ;;  %s1139_s3 = int_to_ptr.vmem [resolvable:$false] %s1138_s3 }
  0x6b   : > { %v1020_v18 = vld [vmem:[#allocation8 + $0x38] sm:$0xff]   ;;  %v1021_v19 = vld [vmem:[#allocation8 + $0x30] sm:$0xff]   ;;  %v1022_v20 = vld [vmem:[#allocation8 + $0x28] sm:$0xff]   ;;  %p1135_p4 = scmp.ne.s32.totalorder %s1448_s16, %s1134_s1  ;;  %s1140_s30 = scalar_lea.vmem %s1139_s3, 256 }
  0x6c   : > { %866 = vmatpush3.bf16.msra.mxu0 %v1005_v2  ;;  %886 = vmatpush3.bf16.msra.mxu1 %v1013_v6  ;;  %v1023_v21 = vld [vmem:[#allocation8 + $0x20] sm:$0xff]   ;;  %v1024_v22 = vld [vmem:[#allocation8 + $0x18] sm:$0xff]   ;;  %v1025_v23 = vld [vmem:[#allocation8 + $0x10] sm:$0xff]   ;;  %p1141_p5 = scmp.lt.s32.totalorder %s1448_s16, %s1139_s3  ;;  %p1142_p3 = scmp.lt.s32.totalorder %s1140_s30, %s1134_s1 }
  0x6d   : > { %867 = vmatprep.subr.bf16.mxu0 %v1214_v0  ;;  %887 = vmatprep.subr.bf16.mxu1 %v1214_v0  ;;  %v805_v24 = vld [vmem:[%s1491_s2] ss:$0 sm:$0xff]  ;;  %v1026_v32 = vld [vmem:[#allocation8 + $0x8] sm:$0xff]   ;;  %v1027_v33 = vld [vmem:[#allocation8] sm:$0xff]   ;;  %p1136_p12 = pnand %p1135_p4, %p1518_p6 }
  0x6e   : > { %v814_v34 = vld [vmem:[%s1493_s4] ss:$0 sm:$0xff]  ;;  %p1143_p7 = por %p1142_p3, %p1141_p5 }
  0x6f   : > { %v823_v42 = vld [vmem:[%s1495_s6] ss:$0 sm:$0xff]  ;;  %p1137_p0 = pneg %p1136_p12 }
  0x70   : > { %868 = vmatpush3.bf16.msra.mxu0 %v1006_v3  ;;  %888 = vmatpush3.bf16.msra.mxu1 %v1014_v8 }
  0x71   : > { %869 = vmatprep.subr.bf16.mxu0 %v1214_v0  ;;  %889 = vmatprep.subr.bf16.mxu1 %v1214_v0  ;;  %p1144_p9 = pnand %p1143_p7, %p1137_p0 }
  0x74   : > { %870 = vmatpush3.bf16.msra.mxu0 %v1007_v5  ;;  %890 = vmatpush3.bf16.msra.mxu1 %v1015_v10 }
  0x75   : > { %871 = vmatprep.subr.bf16.mxu0 %v1214_v0  ;;  %891 = vmatprep.subr.bf16.mxu1 %v1214_v0 }
  0x78   : > { %872 = vmatpush3.bf16.msra.mxu0 %v1008_v7  ;;  %892 = vmatpush3.bf16.msra.mxu1 %v1016_v12 }
  0x79   : > { %873 = vmatprep.subr.bf16.mxu0 %v1214_v0  ;;  %893 = vmatprep.subr.bf16.mxu1 %v1214_v0 }
  0x7c   : > { %874 = vmatpush3.bf16.msra.mxu0 %v1009_v9  ;;  %894 = vmatpush3.bf16.msra.mxu1 %v1017_v14 }
  0x7d   : > { %875 = vmatprep.subr.bf16.mxu0 %v1214_v0  ;;  %895 = vmatprep.subr.bf16.mxu1 %v1214_v0 }
  0x80   : > { %876 = vmatpush3.bf16.msra.mxu0 %v1010_v11  ;;  %896 = vmatpush3.bf16.msra.mxu1 %v1018_v16 }
  0x81   : > { %877 = vmatprep.subr.bf16.mxu0 %v1214_v0  ;;  %897 = vmatprep.subr.bf16.mxu1 %v1214_v0 }
  0x84   : > { %878 = vmatpush3.bf16.msra.mxu0 %v1011_v13  ;;  %898 = vmatpush3.bf16.msra.mxu1 %v1019_v17 }
  0x85   : > { %903 = vmatprep.subr.bf16.mxu0 %v1214_v0 }
  0x87   : > { %880 = vmatmul.mubr.bf16.vlgmr.msra.gmra.mxu0 %v339_v15 }
  0x88   : > { %919 = vmatprep.mubr.msk.bf16.mxu0 %vm1215_vm0, %v1214_v0  ;;  %904 = vmatpush3.bf16.msra.mxu0 %v1020_v18 }
  0x89   : > { %905 = vmatprep.subr.bf16.mxu0 %v1214_v0 }
  0x8c   : > { %906 = vmatpush3.bf16.msra.mxu0 %v1021_v19 }
  0x8d   : > { %907 = vmatprep.subr.bf16.mxu0 %v1214_v0 }
  0x90   : > { %908 = vmatpush3.bf16.msra.mxu0 %v1022_v20 }
  0x91   : > { %909 = vmatprep.subr.bf16.mxu0 %v1214_v0 }
  0x94   : > { %910 = vmatpush3.bf16.msra.mxu0 %v1023_v21 }
  0x95   : > { %911 = vmatprep.subr.bf16.mxu0 %v1214_v0 }
  0x98   : > { %912 = vmatpush3.bf16.msra.mxu0 %v1024_v22 }
  0x99   : > { %913 = vmatprep.subr.bf16.mxu0 %v1214_v0 }
  0x9c   : > { %914 = vmatpush3.bf16.msra.mxu0 %v1025_v23 }
  0x9d   : > { %915 = vmatprep.subr.bf16.mxu0 %v1214_v0 }
  0xa0   : > { %916 = vmatpush3.bf16.msra.mxu0 %v1026_v32 }
  0xa1   : > { %917 = vmatprep.subr.bf16.mxu0 %v1214_v0 }
  0xa4   : > { %918 = vmatpush3.bf16.msra.mxu0 %v1027_v33 }
 0x147   : > { %v445_v25 = vpop.f32.mrf.mxu0 }
 0x148   : > { %v446_v26 = vadd.f32 %v805_v24, %v445_v25 }
 0x149   : > { %v881_v27 = vpop.f32.mrf.mxu0 }
 0x14a   : > { %v451_v28 = vmax.f32 %v446_v26, 0.0 }
 0x14b   : > { %v448_v29 = vpop.f32.mrf.mxu0 }
 0x14c   : > { %v452_v30 = vpack.c.bf16 %v451_v28, %v451_v28 }
 0x14d   : > { %v882_v31 = vpop.f32.mrf.mxu0 }
 0x14e   : > { %900 = vmatmul.mubr.bf16.vlgmr.msra.gmra.mxu1 %v452_v30 }
 0x20e   : > { %v558_v35 = vpop.f32.mrf.mxu1 }
 0x20f   : > { %v559_v36 = vadd.f32 %v814_v34, %v558_v35 }
 0x210   : > { %v901_v37 = vpop.f32.mrf.mxu1 }
 0x211   : > { %v564_v38 = vmax.f32 %v559_v36, 0.0 }
 0x212   : > { %v561_v39 = vpop.f32.mrf.mxu1 }
 0x213   : > { %v565_v40 = vpack.c.bf16 %v564_v38, %v564_v38 }
 0x214   : > { %v902_v41 = vpop.f32.mrf.mxu1 }
 0x215   : > { %920 = vmatmul.mubr.bf16.vlgmr.msra.gmra.mxu0 %v565_v40 }
 0x2d5   : > { %v671_v43 = vpop.f32.mrf.mxu0 }
 0x2d6   : > { %v672_v44 = vadd.f32 %v823_v42, %v671_v43 }
 0x2d7   : > { %v921_v45 = vpop.f32.mrf.mxu0 }
 0x2d8   : > { %677 = vst [vmem:[%s337_s19] sm:$0xff] %v672_v44 }
 0x2d9   : > { %v674_v46 = vpop.f32.mrf.mxu0 }
 0x2da   : > { %1147 = shalt.err (!%p1144_p9)
}
 0x2db   : > { %s1148_s9 = scalar_lea.hbm %s1446_s12, 128  ;;  %s1152_s10 = scalar_lea.hbm %s1496_s7, 256 }
 0x2dc   : > { %p1149_p13 = scmp.ne.s32.totalorder %s1446_s12, %s1148_s9  ;;  %p1153_p10 = scmp.lt.s32.totalorder %s1446_s12, %s1496_s7 }
 0x2dd   : > { %p1154_p11 = scmp.lt.s32.totalorder %s1152_s10, %s1148_s9 }
 0x2de   : > { %p1150_p1 = pnand %p1149_p13, %p1518_p6 }
 0x2df   : > { %p1155_p2 = por %p1154_p11, %p1153_p10 }
 0x2e0   : > { %p1151_p8 = pneg %p1150_p1 }
 0x2e2   : > { %p1156_p4 = pnand %p1155_p2, %p1151_p8 }
 0x2e4   : > { %1159 = shalt.err (!%p1156_p4)
}
 0x2e5   : > { %937 = dma.vmem_to_hbm [thread:$0]  (%p1518_p6), %s1448_s16, 128, %s1446_s12, %s679_s22   ;;  %v922_v47 = vpop.f32.mrf.mxu0 }
 0x2e6 PF: > { %s704_s18 = sand.u32 1, %s1194_s24   ;;  %p1519_p12 = scmp.ne.s32.totalorder %s1504_s8, 0 }
 0x2e7   : > { %p1520_p0 = scmp.ge.s32.totalorder %s1206_s27, 2  ;;  %s705_s19 = scalar_lea.sflag [#allocation4], %s704_s18 }
 0x2e9   : > { %p954_p5 = pnand %p1520_p0, %p1519_p12 }
 0x2eb   : > { %p955_p3 = pneg %p954_p5 }
 0x2ed   : > { %1189 = dma.done.wait (%p955_p3), %s705_s19, 128  }
 0x2ee   : > { %1191 = vsyncadd (%p955_p3), %s705_s19, 4294967168  ;;  %p22_p7 = scmp.ge.s32.totalorder %s1337_s14, 4   ;;  %s1521_s24 = smov %s1198_s25 }
 0x2ef   : > { %s1522_s25 = smov %s1202_s26  ;;  %s1523_s26 = smov %s1347_s17 }
 0x2f0   : > { %s1524_s27 = smov %s1337_s14  ;;  %24 = sbr.rel (!%p22_p7) target bundleno = 10 (0xa), region = 105 }
 0x2f5   :  { %710 = vsyncpa [#allocation3], 1 }
 0x2f6   :  { %712 = vsyncpa [#allocation3 + $0x1], 1 }
 0x2f7   :  { %713 = vsyncpa [#allocation6], 1 }
 0x2f8   :  { %714 = vsyncpa [#allocation9], 1 }
 0x2f9   :  { %715 = vsyncpa [#allocation4], 1 }
 0x2fa   :  { %717 = vsyncpa [#allocation4 + $0x1], 1 }

</bundles_post_ra>
